<compile_context>
chip_gen: v7x
topology: tpu7x:2x2x1
jax: 0.10.0
libtpu: 0.0.40
codegen_flags: <defaults>
</compile_context>

<pallas_src>
import jax
import jax.numpy as jnp
from jax.experimental import pallas as pl
from jax.experimental.pallas import tpu as pltpu


def eeg_classifier_kernel(x_ref, o_ref):
    # x_ref: (TB, C, HW) block in VMEM; o_ref: (TB, HW) output block.
    C = x_ref.shape[1]
    # Explicit slice-adds over the (small, static) channel axis: stays on the
    # VPU, avoids a sublane-axis reduce through the XLU.
    acc = x_ref[:, 0, :].astype(jnp.float32)
    for c in range(1, C):
        acc = acc + x_ref[:, c, :].astype(jnp.float32)
    m = acc * (1.0 / C)                      # mean: mul by constant, no divide
    y = 1.0 / (1.0 + jnp.exp(-m))            # sigmoid; exp lands on the EUP
    o_ref[...] = y.astype(o_ref.dtype)


def _pick_batch_tile(n, per_sample_bytes, budget_bytes):
    """Largest batch tile that fits the VMEM budget (double-buffered in+out).

    If the whole batch fits, use a single block (grid=(1,)).  Otherwise prefer
    tiles that are multiples of 8 (sublane alignment of the (TB, HW) output
    block) and divide N evenly.
    """
    if n * per_sample_bytes <= budget_bytes:
        return n
    best = None
    for tb in range(8, n, 8):
        if n % tb == 0 and tb * per_sample_bytes <= budget_bytes:
            best = tb
    return best if best is not None else n


def eeg_classifier_forward(x, *, vmem_budget_bytes=8 << 20):
    """x: (N, C, H, W) float array -> (N, H, W) sigmoid(mean over C)."""
    N, C, H, W = x.shape
    HW = H * W

    # Lane-dense layout: last block dim becomes HW (multiple of 128 for the
    # demo shape), so DMAs and stores are full-width.
    xf = x.reshape(N, C, HW)

    itemsize = jnp.dtype(x.dtype).itemsize
    # Double-buffered input block + double-buffered output block per sample.
    per_sample = 2 * (C * HW + HW) * itemsize
    tb = _pick_batch_tile(N, per_sample, vmem_budget_bytes)
    grid = (N // tb,)

    out_flat = pl.pallas_call(
        eeg_classifier_kernel,
        out_shape=jax.ShapeDtypeStruct((N, HW), x.dtype),
        grid_spec=pltpu.PrefetchScalarGridSpec(
            num_scalar_prefetch=0,
            grid=grid,
            in_specs=[
                pl.BlockSpec((tb, C, HW), lambda b: (b, 0, 0)),
            ],
            out_specs=pl.BlockSpec((tb, HW), lambda b: (b, 0)),
        ),
        compiler_params=pltpu.CompilerParams(
            # Batch axis is independent work -> shards across the 2 TCs on
            # v7x when grid has >1 step; no-op on v5e/v6e.
            dimension_semantics=("parallel",),
        ),
    )(xf)

    return out_flat.reshape(N, H, W)


if __name__ == "__main__":
    key = jax.random.PRNGKey(0)
    # Small shapes consistent with the module: batch=2, channels=4, 16x16 "spatial"
    x = jax.random.normal(key, (2, 4, 16, 16), dtype=jnp.float32)

    out = eeg_classifier_forward(x)
    out = jax.block_until_ready(out)

    # Reference check in plain JAX (mirrors PyTorch semantics exactly)
    ref = jax.nn.sigmoid(jnp.mean(x, axis=1))
    assert out.shape == ref.shape, (out.shape, ref.shape)
    assert jnp.allclose(out, ref, atol=1e-6, rtol=1e-6), "mismatch vs reference"

    print("KERNEL_OK")
</pallas_src>

<mosaic_0001>
module attributes {stable_mosaic.version = 11 : i64} {
  func.func @eeg_classifier_kernel(%arg0: i32, %arg1: memref<2x4x256xf32, #tpu.memory_space<vmem>>, %arg2: memref<2x256xf32, #tpu.memory_space<vmem>>) attributes {dimension_semantics = [#tpu.dimension_semantics<parallel>], iteration_bounds = array<i64: 1>, scalar_prefetch = 0 : i64, scratch_operands = 0 : i64, tpu.core_type = #tpu.core_type<tc>, window_params = [{transform_indices = @transform_0, window_bounds = array<i64: 2, 4, 256>}, {transform_indices = @transform_1, window_bounds = array<i64: 2, 256>}]} {
    %c0 = arith.constant 0 : index
    %c0_0 = arith.constant 0 : index
    %c0_1 = arith.constant 0 : index
    %0 = vector.load %arg1[%c0, %c0_0, %c0_1] : memref<2x4x256xf32, #tpu.memory_space<vmem>>, vector<2x1x256xf32>
    %1 = vector.shape_cast %0 : vector<2x1x256xf32> to vector<2x256xf32>
    %c0_2 = arith.constant 0 : index
    %c1 = arith.constant 1 : index
    %c0_3 = arith.constant 0 : index
    %2 = vector.load %arg1[%c0_2, %c1, %c0_3] : memref<2x4x256xf32, #tpu.memory_space<vmem>>, vector<2x1x256xf32>
    %3 = vector.shape_cast %2 : vector<2x1x256xf32> to vector<2x256xf32>
    %4 = arith.addf %1, %3 : vector<2x256xf32>
    %c0_4 = arith.constant 0 : index
    %c2 = arith.constant 2 : index
    %c0_5 = arith.constant 0 : index
    %5 = vector.load %arg1[%c0_4, %c2, %c0_5] : memref<2x4x256xf32, #tpu.memory_space<vmem>>, vector<2x1x256xf32>
    %6 = vector.shape_cast %5 : vector<2x1x256xf32> to vector<2x256xf32>
    %7 = arith.addf %4, %6 : vector<2x256xf32>
    %c0_6 = arith.constant 0 : index
    %c3 = arith.constant 3 : index
    %c0_7 = arith.constant 0 : index
    %8 = vector.load %arg1[%c0_6, %c3, %c0_7] : memref<2x4x256xf32, #tpu.memory_space<vmem>>, vector<2x1x256xf32>
    %9 = vector.shape_cast %8 : vector<2x1x256xf32> to vector<2x256xf32>
    %10 = arith.addf %7, %9 : vector<2x256xf32>
    %cst = arith.constant 2.500000e-01 : f32
    %11 = vector.broadcast %cst : f32 to vector<2x256xf32>
    %12 = arith.mulf %10, %11 : vector<2x256xf32>
    %cst_8 = arith.constant 0.000000e+00 : f32
    %13 = vector.broadcast %cst_8 : f32 to vector<2x256xf32>
    %14 = arith.subf %13, %12 : vector<2x256xf32>
    %15 = math.exp %14 : vector<2x256xf32>
    %cst_9 = arith.constant 1.000000e+00 : f32
    %16 = vector.broadcast %cst_9 : f32 to vector<2x256xf32>
    %17 = arith.addf %16, %15 : vector<2x256xf32>
    %cst_10 = arith.constant 1.000000e+00 : f32
    %18 = vector.broadcast %cst_10 : f32 to vector<2x256xf32>
    %19 = arith.divf %18, %17 : vector<2x256xf32>
    %c0_11 = arith.constant 0 : index
    %c0_12 = arith.constant 0 : index
    %20 = vector.load %arg2[%c0_11, %c0_12] : memref<2x256xf32, #tpu.memory_space<vmem>>, vector<2x256xf32>
    tpu.vector_store %arg2[%c0_11, %c0_12], %19 {strides = array<i32>} : memref<2x256xf32, #tpu.memory_space<vmem>>, vector<2x256xf32>,
    return
  }
  func.func @transform_0(%arg0: i32) -> (i32, i32, i32) {
    %c0_i32 = arith.constant 0 : i32
    %c0_i32_0 = arith.constant 0 : i32
    %c0_i32_1 = arith.constant 0 : i32
    return %arg0, %c0_i32, %c0_i32_0 : i32, i32, i32
  }
  func.func @transform_1(%arg0: i32) -> (i32, i32) {
    %c0_i32 = arith.constant 0 : i32
    %c0_i32_0 = arith.constant 0 : i32
    return %arg0, %c0_i32 : i32, i32
  }
}

</mosaic_0001>

<bundles_post_ra>
// kernel: tpu_custom_call.1
= control target key start
LH: loop header
LB: loop body
LE: loop exit
PB: predicated region body
PF: predicated region fallthrough
CT: control target
= control target key end

     0   :  { %6 = vsyncpa [#allocation3], 0  ;;  %s184_s0 = inlined_call_operand.hbm [shape: f32[2,4,256], index: 0, kind: input, shape index: {}]   ;;  %s185_s1 = inlined_call_operand.hbm [shape: f32[2,256], index: 1, kind: output, shape index: {}]  }
   0x1   :  { %7 = vsyncpa [#allocation4], 0  ;;  %s146_s6 = smov [#allocation2]   ;;  %s98_s10 = scalar_lea.hbm %s184_s0, 256 }
   0x2   :  { %s13_s7 = sshll.u32 %s146_s6, 4  ;;  %p99_p0 = scmp.ne.s32.totalorder %s184_s0, %s98_s10  ;;  %s14_s7 = int_to_ptr.vmem [resolvable:$true] %s13_s7 }
   0x3   :  { %p102_p1 = scmp.lt.u32.totalorder %s98_s10, %s184_s0 }
   0x5   :  { %p104_p2 = pnand %p102_p1, %p99_p0 }
   0x7   :  { %107 = shalt.err (!%p104_p2)
}
   0x8   :  { %s108_s15 = scalar_lea.vmem %s14_s7, 256  ;;  %p113_p4 = scmp.lt.s32.totalorder %s14_s7, %s14_s7 }
   0x9   :  { %p109_p3 = scmp.ne.s32.totalorder %s14_s7, %s108_s15  ;;  %p114_p5 = scmp.lt.s32.totalorder %s108_s15, %s108_s15 }
   0xb   :  { %p115_p6 = por %p114_p5, %p113_p4 }
   0xd   :  { %p116_p7 = pnand %p115_p6, %p109_p3 }
   0xf   :  { %119 = shalt.err (!%p116_p7)
}
  0x10   :  { %s147_s16 = smov 128   ;;  %s148_s17 = smov 8  }
  0x11   :  { %19 = dma.hbm_to_vmem [thread:$0]  %s184_s0, 256, %s14_s7, [#allocation3], %s147_s16, %s147_s16, %s148_s17  }
  0x12   :  { %142 = dma.done.wait [#allocation3], 256  }
  0x13   :  { %143 = vsyncadd [#allocation3], 4294967040  ;;  %v23_v0 = vld [vmem:[#allocation2] ss:$4 sm:$0x3]  ;;  %s149_s0 = smov [#allocation5]  }
  0x14   :  { %v25_v1 = vld [vmem:[#allocation2 + $0x8] ss:$4 sm:$0x3]  ;;  %v27_v2 = vld [vmem:[#allocation2 + $0x1] ss:$4 sm:$0x3] }
  0x15   :  { %v29_v3 = vld [vmem:[#allocation2 + $0x9] ss:$4 sm:$0x3]  ;;  %v30_v4 = vadd.f32 %v27_v2, %v23_v0  ;;  %v33_v6 = vld [vmem:[#allocation2 + $0x2] ss:$4 sm:$0x3] }
  0x16   :  { %v31_v5 = vadd.f32 %v29_v3, %v25_v1  ;;  %v35_v7 = vld [vmem:[#allocation2 + $0xa] ss:$4 sm:$0x3]  ;;  %v39_v8 = vld [vmem:[#allocation2 + $0x3] ss:$4 sm:$0x3] }
  0x17   :  { %v41_v9 = vld [vmem:[#allocation2 + $0xb] ss:$4 sm:$0x3]  ;;  %v36_v10 = vadd.f32 %v33_v6, %v30_v4  ;;  %s76_s20 = sshll.u32 %s149_s0, 4  ;;  %s77_s20 = int_to_ptr.vmem [resolvable:$true] %s76_s20 }
  0x18   :  { %v37_v11 = vadd.f32 %v35_v7, %v31_v5  ;;  %s120_s21 = scalar_lea.vmem %s77_s20, 64  ;;  %p125_p9 = scmp.lt.s32.totalorder %s77_s20, %s77_s20 }
  0x19   :  { %v42_v12 = vadd.f32 %v39_v8, %v36_v10  ;;  %p121_p8 = scmp.ne.s32.totalorder %s77_s20, %s120_s21  ;;  %p126_p10 = scmp.lt.s32.totalorder %s120_s21, %s120_s21 }
  0x1a   :  { %v43_v13 = vadd.f32 %v41_v9, %v37_v11 }
  0x1b   :  { %v44_v14 = vmul.f32 0.25, %v42_v12  ;;  %p127_p11 = por %p126_p10, %p125_p9 }
  0x1c   :  { %v45_v15 = vmul.f32 0.25, %v43_v13 }
  0x1d   :  { %v46_v16 = vsub.f32 0.0, %v44_v14  ;;  %p128_p12 = pnand %p127_p11, %p121_p8 }
  0x1e   :  { %v47_v17 = vsub.f32 0.0, %v45_v15 }
  0x1f   :  { %v48_v18 = vmul.f32 1.442695, %v46_v16 }
  0x20   :  { %v50_v19 = vmul.f32 1.442695, %v47_v17 }
  0x21   :  { %90 = vpow2.f32 %v48_v18 }
  0x22   :  { %92 = vpow2.f32 %v50_v19 }
  0x2b   :  { %v91_v20 = vpop.eup %90 }
  0x2c   :  { %v93_v21 = vpop.eup %92  ;;  %v52_v22 = vadd.f32 1.0, %v91_v20 }
  0x2d   :  { %v53_v23 = vadd.f32 1.0, %v93_v21 }
  0x2e   :  { %94 = vrcp.f32 %v52_v22 }
  0x2f   :  { %96 = vrcp.f32 %v53_v23 }
  0x38   :  { %v95_v24 = vpop.eup %94 }
  0x39   :  { %v97_v25 = vpop.eup %96 }
  0x3a   :  { %v60_v26 = vcombine.low %v95_v24, %v97_v25 }
  0x3c   :  { %85 = vst.sshfl [vmem:[#allocation5] sm:$0x33 pattern:$0x75316420] %v60_v26 }
  0x3d   :  { %131 = shalt.err (!%p128_p12)
}
  0x3e   :  { %s132_s24 = scalar_lea.hbm %s185_s1, 64 }
  0x3f   :  { %p133_p13 = scmp.ne.s32.totalorder %s185_s1, %s132_s24  ;;  %p136_p0 = scmp.lt.u32.totalorder %s132_s24, %s185_s1 }
  0x41   :  { %p138_p1 = pnand %p136_p0, %p133_p13 }
  0x43   :  { %141 = shalt.err (!%p138_p1)
}
  0x44   :  { %79 = dma.vmem_to_hbm [thread:$0]  %s77_s20, 64, %s185_s1, [#allocation4]  }
  0x45   :  { %144 = dma.done.wait [#allocation4], 64  }
  0x46   :  { %145 = vsyncadd [#allocation4], 4294967232 }
  0x47   :  { %83 = vsyncpa [#allocation3], 1 }
  0x48   :  { %84 = vsyncpa [#allocation4], 1 }

</bundles_post_ra>
